<compile_context>
chip_gen: v7x
topology: tpu7x:2x2x1
jax: 0.10.0
libtpu: 0.0.40
codegen_flags: <defaults>
</compile_context>

<pallas_src>
import functools
import math

import jax
import jax.numpy as jnp
from jax import lax
from jax.experimental import pallas as pl
from jax.experimental.pallas import tpu as pltpu


# ----------------------------------------------------------------------------
# Pallas kernel
#   t_ref   : (kH*C_in*W_pad, C_out*W_out)  Toeplitz-expanded real-channel weight
#   cb_ref  : (H_out, C_out*W_out)          coord-channel response + conv bias
#   x_ref   : (B_tile, C_in, H, W)          NCHW input block (read directly)
#   o_ref   : (B_tile, H_out, C_out*W_out)  lane-dense output block
#   xpc_ref : (B_tile, H_pad, C_in*W_pad)   VMEM scratch, channel-fused padded slab
# ----------------------------------------------------------------------------
def _coordconv_kernel(t_ref, cb_ref, x_ref, o_ref, xpc_ref, *,
                      C_in, H, W, kH, stride, padding, H_out, W_out, B_tile):
    W_pad = W + 2 * padding
    CWp = C_in * W_pad
    CW = cb_ref.shape[1]                      # C_out * W_out

    # ---- zero-padded, channel-fused slab:  xpc[b, r, ci*W_pad + c] ---------
    if padding > 0:
        # Cheap in the fused layout; re-done every step so it is correct even
        # when the parallel grid axis is partitioned across TensorCores.
        xpc_ref[...] = jnp.zeros(xpc_ref.shape, xpc_ref.dtype)
    xv = x_ref[...].astype(jnp.float32)       # (B, C_in, H, W)
    for ci in range(C_in):
        base = ci * W_pad + padding
        xpc_ref[:, padding:padding + H, base:base + W] = xv[:, ci]

    # ---- im2row over H only; kw / ci are folded into the Toeplitz weight ---
    slabs = []
    for kh in range(kH):
        if stride == 1:
            slab = xpc_ref[:, kh:kh + H_out, :]                       # (B, H_out, CWp)
        else:
            # TODO(synk): strided H-slab read (stride > 1) is a correctness
            # fallback only; not exercised by the demo and left untuned.
            slab = xpc_ref[...][:, kh:kh + (H_out - 1) * stride + 1:stride, :]
        slabs.append(slab.reshape(B_tile * H_out, CWp))               # leading-dim merge
    a_cat = jnp.concatenate(slabs, axis=1)                            # (B*H_out, kH*CWp)

    # One MXU matmul per grid step.
    acc = jnp.dot(a_cat, t_ref[...], preferred_element_type=jnp.float32)
    out = acc.reshape(B_tile, H_out, CW) + cb_ref[...][None]
    o_ref[...] = out.astype(o_ref.dtype)


# ----------------------------------------------------------------------------
# Wrapper helpers
# ----------------------------------------------------------------------------
def _num_tensorcores():
    """Best-effort TensorCore count per device (v7x/v4 expose 2 via megacore)."""
    try:
        kind = jax.devices()[0].device_kind.lower()
    except Exception:
        return 1
    return 2 if ("v7" in kind or "v4" in kind) else 1


def _pick_batch_tile(N, *, per_image_bytes, const_bytes, num_cores,
                     budget_bytes=24 << 20):
    """Largest divisor of N fitting the VMEM budget; keep >=2 steps/core on
    multi-core parts, otherwise minimize grid steps (per-step overhead)."""
    fitting = [d for d in range(1, N + 1)
               if N % d == 0 and d * per_image_bytes + const_bytes <= budget_bytes]
    if not fitting:
        return 1
    if num_cores > 1:
        for min_steps in (2 * num_cores, num_cores, 1):
            ok = [d for d in fitting if N // d >= min_steps]
            if ok:
                return max(ok)
    return max(fitting)


def _build_toeplitz(w_main, *, stride, padding, W, W_out, kW):
    """T[kh*C_in*W_pad + ci*W_pad + c, co*W_out + w] = w_main[co,ci,kh,c-stride*w]
    (0 where c - stride*w is outside [0, kW))."""
    C_out, C_in, kH, _ = w_main.shape
    W_pad = W + 2 * padding
    c_src = jnp.arange(W_pad)
    w_out = jnp.arange(W_out)
    kw_idx = c_src[:, None] - stride * w_out[None, :]          # (W_pad, W_out)
    valid = (kw_idx >= 0) & (kw_idx < kW)
    kw_clamped = jnp.clip(kw_idx, 0, kW - 1)
    g = w_main[:, :, :, kw_clamped]                            # (C_out,C_in,kH,W_pad,W_out)
    g = jnp.where(valid[None, None, None], g, 0.0)
    t = jnp.transpose(g, (2, 1, 3, 0, 4))                      # (kH,C_in,W_pad,C_out,W_out)
    return t.reshape(kH * C_in * W_pad, C_out * W_out)


# ----------------------------------------------------------------------------
# CoordConv2d forward.  Input/output are NCHW (PyTorch convention).
# ----------------------------------------------------------------------------
def coord_conv2d(x_nchw, weight_oihw, bias, *, stride=1, padding=0, b_tile=None):
    N, C_in, H, W = x_nchw.shape
    C_out, C_in_tot, kH, kW = weight_oihw.shape
    assert C_in_tot == C_in + 2, "weight must have C_in + 2 input channels"

    H_pad, W_pad = H + 2 * padding, W + 2 * padding
    H_out = (H_pad - kH) // stride + 1
    W_out = (W_pad - kW) // stride + 1
    CW = C_out * W_out
    CWp = C_in * W_pad

    w = weight_oihw.astype(jnp.float32)
    b = bias.astype(jnp.float32)

    # Toeplitz-expanded weight for the real input channels.
    t2d = _build_toeplitz(w[:, :C_in], stride=stride, padding=padding,
                          W=W, W_out=W_out, kW=kW)              # (kH*CWp, CW)

    # AddCoords fusion: yy/xx channels depend only on (H, W) -> constant map.
    # TODO(synk): like the PyTorch module, coords divide by (H-1)/(W-1) and are
    # undefined for H == 1 or W == 1.
    yy = jnp.arange(H, dtype=jnp.float32) / (H - 1) * 2.0 - 1.0      # varies along H
    xx = jnp.arange(W, dtype=jnp.float32) / (W - 1) * 2.0 - 1.0      # varies along W
    coord = jnp.stack([jnp.broadcast_to(yy[:, None], (H, W)),        # channel C_in   (yy)
                       jnp.broadcast_to(xx[None, :], (H, W))],       # channel C_in+1 (xx)
                      axis=0)                                        # (2, H, W)
    cresp = lax.conv_general_dilated(
        coord[None], w[:, C_in:], (stride, stride),
        [(padding, padding), (padding, padding)],
        dimension_numbers=("NCHW", "OIHW", "NCHW"))[0]               # (C_out,H_out,W_out)
    cbh = jnp.transpose(cresp + b[:, None, None], (1, 0, 2)).reshape(H_out, CW)

    x = x_nchw.astype(jnp.float32)

    # VMEM-budget + core aware batch tiling.
    per_image_bytes = 4 * (2 * C_in * H * W + H_pad * CWp + 2 * H_out * CW)
    const_bytes = 4 * 2 * (t2d.size + cbh.size)
    if b_tile is None:
        b_tile = _pick_batch_tile(N, per_image_bytes=per_image_bytes,
                                  const_bytes=const_bytes,
                                  num_cores=_num_tensorcores())
    if N % b_tile != 0:
        # TODO(synk): generalize with cdiv + tail masking for ragged batches.
        raise ValueError(f"b_tile={b_tile} must divide batch N={N}")
    steps = N // b_tile

    kernel = functools.partial(
        _coordconv_kernel, C_in=C_in, H=H, W=W, kH=kH, stride=stride,
        padding=padding, H_out=H_out, W_out=W_out, B_tile=b_tile)

    cost = pl.CostEstimate(
        flops=int(2 * N * H_out * (kH * CWp) * CW),
        transcendentals=0,
        bytes_accessed=int(4 * (x.size + t2d.size + cbh.size + N * H_out * CW)))

    out3 = pl.pallas_call(
        kernel,
        out_shape=jax.ShapeDtypeStruct((N, H_out, CW), jnp.float32),
        grid_spec=pltpu.PrefetchScalarGridSpec(
            num_scalar_prefetch=0,
            grid=(steps,),
            in_specs=[
                pl.BlockSpec((kH * CWp, CW), lambda n: (0, 0)),          # Toeplitz weight
                pl.BlockSpec((H_out, CW), lambda n: (0, 0)),             # coord bias
                pl.BlockSpec((b_tile, C_in, H, W), lambda n: (n, 0, 0, 0)),  # NCHW input
            ],
            out_specs=pl.BlockSpec((b_tile, H_out, CW), lambda n: (n, 0, 0)),
            scratch_shapes=[pltpu.VMEM((b_tile, H_pad, CWp), jnp.float32)],
        ),
        compiler_params=pltpu.CompilerParams(
            dimension_semantics=("parallel",),
            vmem_limit_bytes=32 * 1024 * 1024,
        ),
        cost_estimate=cost,
    )(t2d, cbh, x)

    # Layout plumbing only: kernel stored a lane-dense (H_out, C_out*W_out)
    # slab; a cheap XLA reshape+transpose produces NCHW.
    return jnp.transpose(out3.reshape(N, H_out, C_out, W_out), (0, 2, 1, 3))


# ----------------------------------------------------------------------------
# Pure-JAX reference (AddCoords + conv) for the correctness check.
# ----------------------------------------------------------------------------
def add_coords_nchw(x):
    n, c, h, w = x.shape
    xx = jnp.arange(w, dtype=jnp.float32) / (w - 1) * 2.0 - 1.0
    yy = jnp.arange(h, dtype=jnp.float32) / (h - 1) * 2.0 - 1.0
    xx_ch = jnp.broadcast_to(xx[None, None, None, :], (n, 1, h, w))
    yy_ch = jnp.broadcast_to(yy[None, None, :, None], (n, 1, h, w))
    return jnp.concatenate([x, yy_ch, xx_ch], axis=1)


def coord_conv2d_ref(x_nchw, weight_oihw, bias, *, stride=1, padding=0):
    x_aug = add_coords_nchw(x_nchw)
    out = lax.conv_general_dilated(
        x_aug.astype(jnp.float32),
        weight_oihw.astype(jnp.float32),
        window_strides=(stride, stride),
        padding=[(padding, padding), (padding, padding)],
        dimension_numbers=("NCHW", "OIHW", "NCHW"))
    return out + bias.reshape(1, -1, 1, 1)


if __name__ == "__main__":
    # CoordConv2d(in_channels=4, out_channels=8, kernel_size=3, stride=1,
    #             padding=1, bias=True)
    in_channels, out_channels, kernel_size, stride, padding = 4, 8, 3, 1, 1
    N, H, W = 2, 16, 16

    key = jax.random.PRNGKey(0)
    kx, kw_, kb = jax.random.split(key, 3)

    x = jax.random.normal(kx, (N, in_channels, H, W), dtype=jnp.float32)
    fan_in = (in_channels + 2) * kernel_size * kernel_size
    bound = 1.0 / math.sqrt(fan_in)
    weight = jax.random.uniform(
        kw_, (out_channels, in_channels + 2, kernel_size, kernel_size),
        minval=-bound, maxval=bound, dtype=jnp.float32)
    bias = jax.random.uniform(kb, (out_channels,), minval=-bound, maxval=bound,
                              dtype=jnp.float32)

    fwd = jax.jit(functools.partial(coord_conv2d, stride=stride, padding=padding))
    out = jax.block_until_ready(fwd(x, weight, bias))

    ref = coord_conv2d_ref(x, weight, bias, stride=stride, padding=padding)
    assert out.shape == ref.shape, (out.shape, ref.shape)
    max_err = float(jnp.max(jnp.abs(out - ref)))
    assert jnp.allclose(out, ref, atol=1e-4, rtol=1e-4), f"mismatch, max_err={max_err}"

    print("KERNEL_OK")
</pallas_src>

<mosaic_0001>
module attributes {stable_mosaic.version = 11 : i64} {
  func.func @_coordconv_kernel(%arg0: i32, %arg1: memref<216x128xf32, #tpu.memory_space<vmem>>, %arg2: memref<16x128xf32, #tpu.memory_space<vmem>>, %arg3: memref<2x4x16x16xf32, #tpu.memory_space<vmem>>, %arg4: memref<2x16x128xf32, #tpu.memory_space<vmem>>, %arg5: memref<2x18x72xf32, #tpu.memory_space<vmem>>) attributes {dimension_semantics = [#tpu.dimension_semantics<parallel>], iteration_bounds = array<i64: 1>, scalar_prefetch = 0 : i64, scratch_operands = 1 : i64, tpu.core_type = #tpu.core_type<tc>, window_params = [{pipeline_mode = #tpu.pipeline_mode<synchronous>, transform_indices = @transform_0, window_bounds = array<i64: 216, 128>}, {pipeline_mode = #tpu.pipeline_mode<synchronous>, transform_indices = @transform_1, window_bounds = array<i64: 16, 128>}, {transform_indices = @transform_2, window_bounds = array<i64: 2, 4, 16, 16>}, {transform_indices = @transform_3, window_bounds = array<i64: 2, 16, 128>}]} {
    %cst = arith.constant 0.000000e+00 : f32
    %0 = vector.broadcast %cst : f32 to vector<2x18x72xf32>
    %c0 = arith.constant 0 : index
    %c0_0 = arith.constant 0 : index
    %c0_1 = arith.constant 0 : index
    %1 = vector.load %arg5[%c0, %c0_0, %c0_1] : memref<2x18x72xf32, #tpu.memory_space<vmem>>, vector<2x18x72xf32>
    tpu.vector_store %arg5[%c0, %c0_0, %c0_1], %0 {strides = array<i32>} : memref<2x18x72xf32, #tpu.memory_space<vmem>>, vector<2x18x72xf32>,
    %c0_2 = arith.constant 0 : index
    %c0_3 = arith.constant 0 : index
    %c0_4 = arith.constant 0 : index
    %c0_5 = arith.constant 0 : index
    %2 = vector.load %arg3[%c0_2, %c0_3, %c0_4, %c0_5] : memref<2x4x16x16xf32, #tpu.memory_space<vmem>>, vector<2x4x16x16xf32>
    %3 = vector.extract_strided_slice %2 {offsets = [0, 0, 0, 0], sizes = [2, 1, 16, 16], strides = [1, 1, 1, 1]} : vector<2x4x16x16xf32> to vector<2x1x16x16xf32>
    %4 = vector.shape_cast %3 : vector<2x1x16x16xf32> to vector<2x16x16xf32>
    %c0_6 = arith.constant 0 : index
    %c1 = arith.constant 1 : index
    %c1_7 = arith.constant 1 : index
    %5 = vector.load %arg5[%c0_6, %c1, %c1_7] : memref<2x18x72xf32, #tpu.memory_space<vmem>>, vector<2x16x16xf32>
    tpu.vector_store %arg5[%c0_6, %c1, %c1_7], %4 {strides = array<i32>} : memref<2x18x72xf32, #tpu.memory_space<vmem>>, vector<2x16x16xf32>,
    %6 = vector.extract_strided_slice %2 {offsets = [0, 1, 0, 0], sizes = [2, 1, 16, 16], strides = [1, 1, 1, 1]} : vector<2x4x16x16xf32> to vector<2x1x16x16xf32>
    %7 = vector.shape_cast %6 : vector<2x1x16x16xf32> to vector<2x16x16xf32>
    %c0_8 = arith.constant 0 : index
    %c1_9 = arith.constant 1 : index
    %c19 = arith.constant 19 : index
    %8 = vector.load %arg5[%c0_8, %c1_9, %c19] : memref<2x18x72xf32, #tpu.memory_space<vmem>>, vector<2x16x16xf32>
    tpu.vector_store %arg5[%c0_8, %c1_9, %c19], %7 {strides = array<i32>} : memref<2x18x72xf32, #tpu.memory_space<vmem>>, vector<2x16x16xf32>,
    %9 = vector.extract_strided_slice %2 {offsets = [0, 2, 0, 0], sizes = [2, 1, 16, 16], strides = [1, 1, 1, 1]} : vector<2x4x16x16xf32> to vector<2x1x16x16xf32>
    %10 = vector.shape_cast %9 : vector<2x1x16x16xf32> to vector<2x16x16xf32>
    %c0_10 = arith.constant 0 : index
    %c1_11 = arith.constant 1 : index
    %c37 = arith.constant 37 : index
    %11 = vector.load %arg5[%c0_10, %c1_11, %c37] : memref<2x18x72xf32, #tpu.memory_space<vmem>>, vector<2x16x16xf32>
    tpu.vector_store %arg5[%c0_10, %c1_11, %c37], %10 {strides = array<i32>} : memref<2x18x72xf32, #tpu.memory_space<vmem>>, vector<2x16x16xf32>,
    %12 = vector.extract_strided_slice %2 {offsets = [0, 3, 0, 0], sizes = [2, 1, 16, 16], strides = [1, 1, 1, 1]} : vector<2x4x16x16xf32> to vector<2x1x16x16xf32>
    %13 = vector.shape_cast %12 : vector<2x1x16x16xf32> to vector<2x16x16xf32>
    %c0_12 = arith.constant 0 : index
    %c1_13 = arith.constant 1 : index
    %c55 = arith.constant 55 : index
    %14 = vector.load %arg5[%c0_12, %c1_13, %c55] : memref<2x18x72xf32, #tpu.memory_space<vmem>>, vector<2x16x16xf32>
    tpu.vector_store %arg5[%c0_12, %c1_13, %c55], %13 {strides = array<i32>} : memref<2x18x72xf32, #tpu.memory_space<vmem>>, vector<2x16x16xf32>,
    %c0_14 = arith.constant 0 : index
    %c0_15 = arith.constant 0 : index
    %c0_16 = arith.constant 0 : index
    %15 = vector.load %arg5[%c0_14, %c0_15, %c0_16] : memref<2x18x72xf32, #tpu.memory_space<vmem>>, vector<2x16x72xf32>
    %16 = vector.shape_cast %15 : vector<2x16x72xf32> to vector<32x72xf32>
    %c0_17 = arith.constant 0 : index
    %c1_18 = arith.constant 1 : index
    %c0_19 = arith.constant 0 : index
    %17 = vector.load %arg5[%c0_17, %c1_18, %c0_19] : memref<2x18x72xf32, #tpu.memory_space<vmem>>, vector<2x16x72xf32>
    %18 = vector.shape_cast %17 : vector<2x16x72xf32> to vector<32x72xf32>
    %c0_20 = arith.constant 0 : index
    %c2 = arith.constant 2 : index
    %c0_21 = arith.constant 0 : index
    %19 = vector.load %arg5[%c0_20, %c2, %c0_21] : memref<2x18x72xf32, #tpu.memory_space<vmem>>, vector<2x16x72xf32>
    %20 = vector.shape_cast %19 : vector<2x16x72xf32> to vector<32x72xf32>
    %21 = tpu.concatenate %16, %18, %20 in 1 : vector<32x72xf32>, vector<32x72xf32>, vector<32x72xf32> -> vector<32x216xf32>
    %c0_22 = arith.constant 0 : index
    %c0_23 = arith.constant 0 : index
    %22 = vector.load %arg1[%c0_22, %c0_23] : memref<216x128xf32, #tpu.memory_space<vmem>>, vector<216x128xf32>
    %cst_24 = arith.constant dense<0.000000e+00> : vector<32x128xf32>
    %23 = tpu.matmul %21, %22, %cst_24 {dimension_numbers = #tpu.dot_dimension_numbers<[1], [0], [0], [1], [0, 0, 1, 1], [], []>} : vector<32x216xf32>, vector<216x128xf32>, vector<32x128xf32> -> vector<32x128xf32>
    %24 = vector.shape_cast %23 : vector<32x128xf32> to vector<2x16x128xf32>
    %c0_25 = arith.constant 0 : index
    %c0_26 = arith.constant 0 : index
    %25 = vector.load %arg2[%c0_25, %c0_26] : memref<16x128xf32, #tpu.memory_space<vmem>>, vector<16x128xf32>
    %26 = vector.shape_cast %25 : vector<16x128xf32> to vector<1x16x128xf32>
    %27 = vector.broadcast %26 : vector<1x16x128xf32> to vector<2x16x128xf32>
    %28 = arith.addf %24, %27 : vector<2x16x128xf32>
    %c0_27 = arith.constant 0 : index
    %c0_28 = arith.constant 0 : index
    %c0_29 = arith.constant 0 : index
    %29 = vector.load %arg4[%c0_27, %c0_28, %c0_29] : memref<2x16x128xf32, #tpu.memory_space<vmem>>, vector<2x16x128xf32>
    tpu.vector_store %arg4[%c0_27, %c0_28, %c0_29], %28 {strides = array<i32>} : memref<2x16x128xf32, #tpu.memory_space<vmem>>, vector<2x16x128xf32>,
    return
  }
  func.func @transform_0(%arg0: i32) -> (i32, i32) {
    %c0_i32 = arith.constant 0 : i32
    %c0_i32_0 = arith.constant 0 : i32
    %c0_i32_1 = arith.constant 0 : i32
    return %c0_i32, %c0_i32_0 : i32, i32
  }
  func.func @transform_1(%arg0: i32) -> (i32, i32) {
    %c0_i32 = arith.constant 0 : i32
    %c0_i32_0 = arith.constant 0 : i32
    %c0_i32_1 = arith.constant 0 : i32
    return %c0_i32, %c0_i32_0 : i32, i32
  }
  func.func @transform_2(%arg0: i32) -> (i32, i32, i32, i32) {
    %c0_i32 = arith.constant 0 : i32
    %c0_i32_0 = arith.constant 0 : i32
    %c0_i32_1 = arith.constant 0 : i32
    %c0_i32_2 = arith.constant 0 : i32
    return %arg0, %c0_i32, %c0_i32_0, %c0_i32_1 : i32, i32, i32, i32
  }
  func.func @transform_3(%arg0: i32) -> (i32, i32, i32) {
    %c0_i32 = arith.constant 0 : i32
    %c0_i32_0 = arith.constant 0 : i32
    %c0_i32_1 = arith.constant 0 : i32
    return %arg0, %c0_i32, %c0_i32_0 : i32, i32, i32
  }
}

</mosaic_0001>

<bundles_post_ra>
// kernel: coord_conv2d.1
= control target key start
LH: loop header
LB: loop body
LE: loop exit
PB: predicated region body
PF: predicated region fallthrough
CT: control target
= control target key end

     0   :  { %vm14_vm0 = vcmask 588800   ;;  %vm17_vm1 = vcmask 582656   ;;  %v393_v2 = vmov 0.0   ;;  %s394_s16 = smov 1   ;;  %s395_s25 = smov 19   ;;  %v398_v17 = vmov 0.0|0.0   ;;  %s618_s2 = inlined_call_operand.vmem [shape: f32[2,4,16,16], index: 2, kind: input, shape index: {}]   ;;  %s619_s0 = inlined_call_operand.vmem [shape: f32[216,128], index: 0, kind: input, shape index: {}]   ;;  %s620_s1 = inlined_call_operand.vmem [shape: f32[16,128], index: 1, kind: input, shape index: {}]   ;;  %s621_s3 = inlined_call_operand.vmem [shape: f32[2,16,128], index: 3, kind: output, shape index: {}]  }
   0x1   :  { %v30_v0 = vld [vmem:[%s618_s2 + $0x40] sm:$0xff]  ;;  %19 = vst.msk [vmem:[#allocation2 + $0x18] sm:$0xff] %vm14_vm0, %v393_v2  ;;  %20 = vst.msk [vmem:[#allocation2 + $0x20] sm:$0xff] %vm14_vm0, %v393_v2  ;;  %v31_v3 = vld [vmem:[%s618_s2 + $0x48] sm:$0xff]  ;;  %s396_s7 = smov 37   ;;  %318 = vmatprep.subr.bf16.mxu0 %v398_v17  ;;  %357 = vmatprep.subr.bf16.mxu1 %v398_v17  ;;  %vm54_vm2 = vcmask 138248  }
   0x2   :  { %v22_v1 = vld [vmem:[%s618_s2] sm:$0xff]  ;;  %15 = vst.msk [vmem:[#allocation2] sm:$0xff] %vm14_vm0, %v393_v2  ;;  %16 = vst.msk [vmem:[#allocation2 + $0x8] sm:$0xff] %vm14_vm0, %v393_v2  ;;  %46 = vrot.lane.b32.xlu1 %v30_v0, %s394_s16  ;;  %v23_v4 = vld [vmem:[%s618_s2 + $0x8] sm:$0xff]  ;;  %vm75_vm3 = vcmask 285848   ;;  %vm96_vm4 = vcmask 433448  }
   0x3   :  { %21 = vst.msk [vmem:[#allocation2 + $0x28] sm:$0x3] %vm17_vm1, %v393_v2  ;;  %18 = vst.msk [vmem:[#allocation2 + $0x10] sm:$0x3] %vm17_vm1, %v393_v2  ;;  %42 = vrot.lane.b32.xlu0 %v22_v1, %s394_s16  ;;  %v25_v5 = vld [vmem:[%s618_s2 + $0x18] sm:$0xff]  ;;  %v24_v6 = vld [vmem:[%s618_s2 + $0x10] sm:$0xff] }
   0x4   :  { %v33_v7 = vld [vmem:[%s618_s2 + $0x58] sm:$0xff]  ;;  %v32_v8 = vld [vmem:[%s618_s2 + $0x50] sm:$0xff]  ;;  %v27_v9 = vld [vmem:[%s618_s2 + $0x28] sm:$0xff]  ;;  %vm117_vm5 = vcmask 581048   ;;  %s399_s19 = smov 72   ;;  %s400_s20 = smov 16  }
   0x5   :  { %v26_v10 = vld [vmem:[%s618_s2 + $0x20] sm:$0xff]  ;;  %v35_v11 = vld [vmem:[%s618_s2 + $0x68] sm:$0xff]  ;;  %v29_v13 = vld [vmem:[%s618_s2 + $0x38] sm:$0xff]  ;;  %vm170_vm6 = vcmask 130048   ;;  %vm202_vm7 = vcmask 719872  }
   0x6   :  { %48 = vrot.lane.b32.xlu1 %v31_v3, %s394_s16  ;;  %v34_v12 = vld [vmem:[%s618_s2 + $0x60] sm:$0xff]  ;;  %v28_v14 = vld [vmem:[%s618_s2 + $0x30] sm:$0xff]  ;;  %v37_v15 = vld [vmem:[%s618_s2 + $0x78] sm:$0xff] }
   0x7   :  { %44 = vrot.lane.b32.xlu0 %v23_v4, %s394_s16  ;;  %s397_s16 = smov 55   ;;  %v36_v16 = vld [vmem:[%s618_s2 + $0x70] sm:$0xff]  ;;  %v175_v18 = vld [vmem:[%s619_s0] sm:$0xff]  ;;  %v176_v19 = vld [vmem:[%s619_s0 + $0x8] sm:$0xff] }
   0x8   :  { %v177_v20 = vld [vmem:[%s619_s0 + $0x10] sm:$0xff]  ;;  %v319_v21 = vpack.c.bf16 %v176_v19, %v175_v18  ;;  %v178_v22 = vld [vmem:[%s619_s0 + $0x18] sm:$0xff]  ;;  %v179_v24 = vld [vmem:[%s619_s0 + $0x20] sm:$0xff] }
   0x9   :  { %v322_v23 = vpack.c.bf16 %v178_v22, %v177_v20  ;;  %v180_v25 = vld [vmem:[%s619_s0 + $0x28] sm:$0xff]  ;;  %v181_v27 = vld [vmem:[%s619_s0 + $0x30] sm:$0xff]  ;;  %v182_v28 = vld [vmem:[%s619_s0 + $0x38] sm:$0xff] }
   0xa   :  { %65 = vrot.lane.b32.xlu1 %v25_v5, %s395_s25  ;;  %320 = vmatpush1.bf16.msra.mxu0 %v319_v21  ;;  %v325_v26 = vpack.c.bf16 %v180_v25, %v179_v24  ;;  %v328_v29 = vpack.c.bf16 %v182_v28, %v181_v27  ;;  %v183_v30 = vld [vmem:[%s619_s0 + $0x40] sm:$0xff]  ;;  %v184_v31 = vld [vmem:[%s619_s0 + $0x48] sm:$0xff]  ;;  %v185_v33 = vld [vmem:[%s619_s0 + $0x50] sm:$0xff] }
   0xb   :  { %63 = vrot.lane.b32.xlu0 %v24_v6, %s395_s25  ;;  %371 = vmatpush1.bf16.msra.mxu1 %v319_v21  ;;  %v331_v32 = vpack.c.bf16 %v184_v31, %v183_v30  ;;  %v186_v34 = vld [vmem:[%s619_s0 + $0x58] sm:$0xff]  ;;  %v187_v36 = vld [vmem:[%s619_s0 + $0x60] sm:$0xff]  ;;  %v188_v37 = vld [vmem:[%s619_s0 + $0x68] sm:$0xff] }
   0xc   :  { %321 = vmatprep.subr.bf16.mxu0 %v398_v17  ;;  %358 = vmatprep.subr.bf16.mxu1 %v398_v17  ;;  %v334_v35 = vpack.c.bf16 %v186_v34, %v185_v33  ;;  %v337_v38 = vpack.c.bf16 %v188_v37, %v187_v36  ;;  %v189_v39 = vld [vmem:[%s619_s0 + $0x70] sm:$0xff]  ;;  %v190_v40 = vld [vmem:[%s619_s0 + $0x78] sm:$0xff]  ;;  %v191_v42 = vld [vmem:[%s619_s0 + $0x80] sm:$0xff] }
   0xd   :  { %v340_v41 = vpack.c.bf16 %v190_v40, %v189_v39  ;;  %v192_v43 = vld [vmem:[%s619_s0 + $0x88] sm:$0xff]  ;;  %v193_v45 = vld [vmem:[%s619_s0 + $0x90] sm:$0xff]  ;;  %v194_v46 = vld [vmem:[%s619_s0 + $0x98] sm:$0xff] }
   0xe   :  { %69 = vrot.lane.b32.xlu1 %v33_v7, %s395_s25  ;;  %323 = vmatpush1.bf16.msra.mxu0 %v322_v23  ;;  %v343_v44 = vpack.c.bf16 %v192_v43, %v191_v42  ;;  %v346_v47 = vpack.c.bf16 %v194_v46, %v193_v45  ;;  %v195_v48 = vld [vmem:[%s619_s0 + $0xa0] sm:$0xff]  ;;  %v196_v49 = vld [vmem:[%s619_s0 + $0xa8] sm:$0xff]  ;;  %v197_v51 = vld [vmem:[%s619_s0 + $0xb0] sm:$0xff] }
   0xf   :  { %67 = vrot.lane.b32.xlu0 %v32_v8, %s395_s25  ;;  %372 = vmatpush1.bf16.msra.mxu1 %v322_v23  ;;  %v349_v50 = vpack.c.bf16 %v196_v49, %v195_v48  ;;  %v198_v52 = vld [vmem:[%s619_s0 + $0xb8] sm:$0xff]  ;;  %v199_v0 = vld [vmem:[%s619_s0 + $0xc0] sm:$0xff]  ;;  %v200_v1 = vld [vmem:[%s619_s0 + $0xc8] sm:$0xff] }
  0x10   :  { %324 = vmatprep.subr.bf16.mxu0 %v398_v17  ;;  %359 = vmatprep.subr.bf16.mxu1 %v398_v17  ;;  %v352_v53 = vpack.c.bf16 %v198_v52, %v197_v51  ;;  %v355_v3 = vpack.c.bf16 %v200_v1, %v199_v0  ;;  %v201_v6 = vld [vmem:[%s619_s0 + $0xd0] sm:$0xff]  ;;  %v301_v45 = vld [vmem:[%s620_s1 + $0x8] sm:$0xff] }
  0x12   :  { %86 = vrot.lane.b32.xlu1 %v27_v9, %s396_s7  ;;  %326 = vmatpush1.bf16.msra.mxu0 %v325_v26 }
  0x13   :  { %84 = vrot.lane.b32.xlu0 %v26_v10, %s396_s7  ;;  %373 = vmatpush1.bf16.msra.mxu1 %v325_v26 }
  0x14   :  { %327 = vmatprep.subr.bf16.mxu0 %v398_v17  ;;  %360 = vmatprep.subr.bf16.mxu1 %v398_v17 }
  0x16   :  { %90 = vrot.lane.b32.xlu1 %v35_v11, %s396_s7  ;;  %329 = vmatpush1.bf16.msra.mxu0 %v328_v29 }
  0x17   :  { %88 = vrot.lane.b32.xlu0 %v34_v12, %s396_s7  ;;  %374 = vmatpush1.bf16.msra.mxu1 %v328_v29 }
  0x18   :  { %330 = vmatprep.subr.bf16.mxu0 %v398_v17  ;;  %361 = vmatprep.subr.bf16.mxu1 %v398_v17 }
  0x1a   :  { %107 = vrot.lane.b32.xlu1 %v29_v13, %s397_s16  ;;  %332 = vmatpush1.bf16.msra.mxu0 %v331_v32 }
  0x1b   :  { %105 = vrot.lane.b32.xlu0 %v28_v14, %s397_s16  ;;  %375 = vmatpush1.bf16.msra.mxu1 %v331_v32 }
  0x1c   :  { %333 = vmatprep.subr.bf16.mxu0 %v398_v17  ;;  %362 = vmatprep.subr.bf16.mxu1 %v398_v17 }
  0x1e   :  { %111 = vrot.lane.b32.xlu1 %v37_v15, %s397_s16  ;;  %335 = vmatpush1.bf16.msra.mxu0 %v334_v35 }
  0x1f   :  { %109 = vrot.lane.b32.xlu0 %v36_v16, %s397_s16  ;;  %376 = vmatpush1.bf16.msra.mxu1 %v334_v35 }
  0x20   :  { %336 = vmatprep.subr.bf16.mxu0 %v398_v17  ;;  %363 = vmatprep.subr.bf16.mxu1 %v398_v17 }
  0x22   :  { %338 = vmatpush1.bf16.msra.mxu0 %v337_v38 }
  0x23   :  { %377 = vmatpush1.bf16.msra.mxu1 %v337_v38  ;;  %339 = vmatprep.subr.bf16.mxu0 %v398_v17  ;;  %v300_v38 = vld [vmem:[%s620_s1] sm:$0xff] }
  0x24   :  { %364 = vmatprep.subr.bf16.mxu1 %v398_v17 }
  0x26   :  { %341 = vmatpush1.bf16.msra.mxu0 %v340_v41 }
  0x27   :  { %378 = vmatpush1.bf16.msra.mxu1 %v340_v41  ;;  %342 = vmatprep.subr.bf16.mxu0 %v398_v17 }
  0x28   :  { %365 = vmatprep.subr.bf16.mxu1 %v398_v17 }
  0x2a   :  { %344 = vmatpush1.bf16.msra.mxu0 %v343_v44 }
  0x2b   :  { %379 = vmatpush1.bf16.msra.mxu1 %v343_v44  ;;  %345 = vmatprep.subr.bf16.mxu0 %v398_v17 }
  0x2c   :  { %366 = vmatprep.subr.bf16.mxu1 %v398_v17 }
  0x2e   :  { %347 = vmatpush1.bf16.msra.mxu0 %v346_v47 }
  0x2f   :  { %380 = vmatpush1.bf16.msra.mxu1 %v346_v47  ;;  %348 = vmatprep.subr.bf16.mxu0 %v398_v17 }
  0x30   :  { %367 = vmatprep.subr.bf16.mxu1 %v398_v17 }
  0x32   :  { %350 = vmatpush1.bf16.msra.mxu0 %v349_v50 }
  0x33   :  { %381 = vmatpush1.bf16.msra.mxu1 %v349_v50  ;;  %351 = vmatprep.subr.bf16.mxu0 %v398_v17 }
  0x34   :  { %368 = vmatprep.subr.bf16.mxu1 %v398_v17 }
  0x36   :  { %353 = vmatpush1.bf16.msra.mxu0 %v352_v53 }
  0x37   :  { %382 = vmatpush1.bf16.msra.mxu1 %v352_v53  ;;  %354 = vmatprep.subr.bf16.mxu0 %v398_v17 }
  0x38   :  { %369 = vmatprep.subr.bf16.mxu1 %v398_v17 }
  0x3a   :  { %356 = vmatpush1.bf16.msra.mxu0 %v355_v3 }
  0x3b   :  { %383 = vmatpush1.bf16.msra.mxu1 %v355_v3  ;;  %267 = vmatprep.subr.mxu0 %v393_v2 }
  0x3c   :  { %370 = vmatprep.subr.mxu1 %v393_v2 }
  0x3e   :  { %268 = vmatpush1.msra.mxu0 %v201_v6 }
  0x3f   :  { %384 = vmatpush1.msra.mxu1 %v201_v6 }
  0x74   :  { %v47_v54 = vpop.permute.xlu1 %46 }
  0x75   :  { %v43_v55 = vpop.permute.xlu0 %42  ;;  %57 = vst.msk [vmem:[#allocation2 + $0x19] sm:$0xff] %vm54_vm2, %v47_v54 }
  0x76   :  { %55 = vst.msk [vmem:[#allocation2 + $0x1] sm:$0xff] %vm54_vm2, %v43_v55 }
  0x78   :  { %v49_v56 = vpop.permute.xlu1 %48 }
  0x79   :  { %v45_v57 = vpop.permute.xlu0 %44  ;;  %58 = vst.msk [vmem:[#allocation2 + $0x21] sm:$0xff] %vm54_vm2, %v49_v56 }
  0x7a   :  { %56 = vst.msk [vmem:[#allocation2 + $0x9] sm:$0xff] %vm54_vm2, %v45_v57 }
  0x7c   :  { %v66_v58 = vpop.permute.xlu1 %65 }
  0x7d   :  { %v64_v59 = vpop.permute.xlu0 %63  ;;  %77 = vst.msk [vmem:[#allocation2 + $0x9] sm:$0xff] %vm75_vm3, %v66_v58 }
  0x7e   :  { %76 = vst.msk [vmem:[#allocation2 + $0x1] sm:$0xff] %vm75_vm3, %v64_v59 }
  0x80   :  { %v70_v60 = vpop.permute.xlu1 %69 }
  0x81   :  { %v68_v61 = vpop.permute.xlu0 %67  ;;  %79 = vst.msk [vmem:[#allocation2 + $0x21] sm:$0xff] %vm75_vm3, %v70_v60 }
  0x82   :  { %78 = vst.msk [vmem:[#allocation2 + $0x19] sm:$0xff] %vm75_vm3, %v68_v61 }
  0x84   :  { %v87_v62 = vpop.permute.xlu1 %86 }
  0x85   :  { %v85_v63 = vpop.permute.xlu0 %84  ;;  %98 = vst.msk [vmem:[#allocation2 + $0x9] sm:$0xff] %vm96_vm4, %v87_v62 }
  0x86   :  { %97 = vst.msk [vmem:[#allocation2 + $0x1] sm:$0xff] %vm96_vm4, %v85_v63 }
  0x88   :  { %v91_v4 = vpop.permute.xlu1 %90 }
  0x89   :  { %v89_v5 = vpop.permute.xlu0 %88  ;;  %100 = vst.msk [vmem:[#allocation2 + $0x21] sm:$0xff] %vm96_vm4, %v91_v4 }
  0x8a   :  { %99 = vst.msk [vmem:[#allocation2 + $0x19] sm:$0xff] %vm96_vm4, %v89_v5 }
  0x8c   :  { %v108_v7 = vpop.permute.xlu1 %107 }
  0x8d   :  { %v106_v8 = vpop.permute.xlu0 %105  ;;  %119 = vst.msk [vmem:[#allocation2 + $0x9] sm:$0xff] %vm117_vm5, %v108_v7 }
  0x8e   :  { %118 = vst.msk [vmem:[#allocation2 + $0x1] sm:$0xff] %vm117_vm5, %v106_v8 }
  0x90   :  { %v112_v9 = vpop.permute.xlu1 %111 }
  0x91   :  { %v110_v10 = vpop.permute.xlu0 %109  ;;  %121 = vst.msk [vmem:[#allocation2 + $0x21] sm:$0xff] %vm117_vm5, %v112_v9 }
  0x92   :  { %120 = vst.msk [vmem:[#allocation2 + $0x19] sm:$0xff] %vm117_vm5, %v110_v10 }
  0x94   :  { %v127_v2 = vld [vmem:[#allocation2 + $0x9] sm:$0xff] }
  0x95   :  { %v126_v11 = vld [vmem:[#allocation2 + $0x1] sm:$0xff]  ;;  %v131_v15 = vld [vmem:[#allocation2 + $0xa] sm:$0xff] }
  0x96   :  { %138 = vrot.lane.b32.xlu0 %v126_v11, %s399_s19  ;;  %v130_v12 = vld [vmem:[#allocation2 + $0x2] sm:$0xff] }
  0x97   :  { %v122_v22 = vld [vmem:[#allocation2] sm:$0xff]  ;;  %v123_v32 = vld [vmem:[#allocation2 + $0x8] sm:$0xff] }
  0x98   :  { %v129_v16 = vld [vmem:[#allocation2 + $0x21] sm:$0xff] }
  0x99   :  { %v128_v13 = vld [vmem:[#allocation2 + $0x19] sm:$0xff]  ;;  %v133_v17 = vld [vmem:[#allocation2 + $0x22] sm:$0xff] }
  0x9a   :  { %154 = vrot.lane.b32.xlu0 %v130_v12, %s400_s20  ;;  %142 = vrot.lane.b32.xlu1 %v128_v13, %s399_s19  ;;  %v132_v14 = vld [vmem:[#allocation2 + $0x1a] sm:$0xff] }
  0x9b   :  { %v124_v27 = vld [vmem:[#allocation2 + $0x18] sm:$0xff]  ;;  %v125_v36 = vld [vmem:[#allocation2 + $0x20] sm:$0xff] }
  0x9e   :  { %140 = vrot.lane.b32.xlu0 %v127_v2, %s399_s19  ;;  %158 = vrot.lane.b32.xlu1 %v132_v14, %s400_s20 }
  0xa2   :  { %156 = vrot.lane.b32.xlu0 %v131_v15, %s400_s20  ;;  %144 = vrot.lane.b32.xlu1 %v129_v16, %s399_s19 }
  0xa6   :  { %160 = vrot.lane.b32.xlu1 %v133_v17, %s400_s20 }
 0x108   :  { %v139_v18 = vpop.permute.xlu0 %138 }
 0x109   :  { %v166_v23 = vsel %vm14_vm0, %v122_v22, %v139_v18 }
 0x10c   :  { %v143_v19 = vpop.permute.xlu1 %142  ;;  %v155_v20 = vpop.permute.xlu0 %154 }
 0x10d   :  { %v171_v21 = vsel %vm170_vm6, %v139_v18, %v155_v20  ;;  %v168_v28 = vsel %vm14_vm0, %v124_v27, %v143_v19 }
 0x10e   :  { %314 = vmatprep.mubr.msk.f32.mxu0 %vm202_vm7, %v171_v21 }
 0x10f   :  { %280 = vmatmul.mubr.f32.vlgmr.msra.gmra.mrb[0].mxu0 %v166_v23 }
 0x110   :  { %v159_v24 = vpop.permute.xlu1 %158  ;;  %v141_v25 = vpop.permute.xlu0 %140 }
 0x111   :  { %v173_v26 = vsel %vm170_vm6, %v143_v19, %v159_v24  ;;  %v167_v33 = vsel %vm14_vm0, %v123_v32, %v141_v25 }
 0x112   :  { %316 = vmatprep.mubr.msk.f32.mxu1 %vm202_vm7, %v173_v26 }
 0x113   :  { %290 = vmatmul.mubr.f32.vlgmr.msra.gmra.mrb[0].mxu1 %v168_v28 }
 0x114   :  { %v145_v29 = vpop.permute.xlu1 %144  ;;  %v157_v30 = vpop.permute.xlu0 %156 }
 0x115   :  { %v172_v31 = vsel %vm170_vm6, %v141_v25, %v157_v30  ;;  %v169_v37 = vsel %vm14_vm0, %v125_v36, %v145_v29 }
 0x116   :  { %315 = vmatprep.mubr.msk.f32.mxu0 %vm202_vm7, %v172_v31 }
 0x117   :  { %285 = vmatmul.mubr.f32.gmra.mrb[2].mxu0 %v167_v33 }
 0x118   :  { %v161_v34 = vpop.permute.xlu1 %160 }
 0x119   :  { %v174_v35 = vsel %vm170_vm6, %v145_v29, %v161_v34 }
 0x11a   :  { %317 = vmatprep.mubr.msk.f32.mxu1 %vm202_vm7, %v174_v35 }
 0x11b   :  { %295 = vmatmul.mubr.f32.gmra.mrb[2].mxu1 %v169_v37 }
 0x1e2   :  { %v281_v39 = vpop.f32.mrb[0].mxu0 }
 0x1e3   :  { %v302_v40 = vadd.f32 %v300_v38, %v281_v39  ;;  %v283_v41 = vpop.f32.mrb[1].mxu0 }
 0x1e5   :  { %306 = vst [vmem:[%s621_s3] sm:$0xff] %v302_v40 }
 0x1e6   :  { %v291_v42 = vpop.f32.mrb[0].mxu1 }
 0x1e7   :  { %v304_v43 = vadd.f32 %v300_v38, %v291_v42  ;;  %v293_v44 = vpop.f32.mrb[1].mxu1 }
 0x1e9   :  { %308 = vst [vmem:[%s621_s3 + $0x10] sm:$0xff] %v304_v43 }
 0x1ea   :  { %v286_v46 = vpop.f32.mrb[2].mxu0 }
 0x1eb   :  { %v303_v47 = vadd.f32 %v301_v45, %v286_v46  ;;  %v288_v48 = vpop.f32.mrb[3].mxu0 }
 0x1ed   :  { %307 = vst [vmem:[%s621_s3 + $0x8] sm:$0xff] %v303_v47 }
 0x1ee   :  { %v296_v49 = vpop.f32.mrb[2].mxu1 }
 0x1ef   :  { %v305_v50 = vadd.f32 %v301_v45, %v296_v49  ;;  %v298_v51 = vpop.f32.mrb[3].mxu1 }
 0x1f1   :  { %309 = vst [vmem:[%s621_s3 + $0x18] sm:$0xff] %v305_v50 }

</bundles_post_ra>
